<compile_context>
chip_gen: v7x
topology: tpu7x:2x2x1
jax: 0.10.0
libtpu: 0.0.40
codegen_flags: <defaults>
</compile_context>

<pallas_src>
import jax
import jax.numpy as jnp
from jax.experimental import pallas as pl
from jax.experimental.pallas import tpu as pltpu


def _identity_kernel(x_ref, o_ref):
    # Whole "compute" of PrintLayer: copy the current tile.
    o_ref[...] = x_ref[...]


def _largest_dividing_multiple(n, base, cap):
    """Largest multiple of `base` that divides n and is <= cap (None if none)."""
    if n <= 0 or n % base != 0:
        return None
    d = (min(cap, n) // base) * base
    while d >= base:
        if n % d == 0:
            return d
        d -= base
    return None


def _hw_params():
    """(row_tile_cap, col_tile_cap, vmem_limit_bytes), conservative by default."""
    kind = ""
    try:
        kind = jax.devices()[0].device_kind.lower()
    except Exception:
        pass
    if ("v6" in kind) or ("v7" in kind):
        # 8 MiB f32 tiles; 2 bufs x (in + out) = 32 MiB, fits v7x 64 MiB VMEM.
        return 1024, 2048, 48 * 1024 * 1024
    # v5e / unknown: 4 MiB tiles; scoped-VMEM default is only 16 MiB -> raise.
    return 512, 2048, 32 * 1024 * 1024


def print_layer(x, run_kernel=False):
    """PrintLayer.forward: print x.shape and return x unchanged.

    By default this short-circuits (no copy at all).  run_kernel=True routes
    the identity through the Pallas kernel (for testing the kernel path).
    """
    print(tuple(x.shape))

    if not run_kernel or x.size == 0:
        return x

    orig_shape = x.shape
    n = x.size
    tr_cap, tc_cap, vmem_limit = _hw_params()

    # ---- lane-dense 2D layout (last dim a multiple of 128 dividing n) ------
    pad = 0
    cols = _largest_dividing_multiple(n, 128, tc_cap)
    if cols is not None:
        x2 = x.reshape(-1, cols)
    else:
        # Ragged element count: pad the flat vector to a 128 multiple so every
        # store is full-lane (unmasked vst); slice the padding off afterwards.
        flat = x.reshape(-1)
        cols = 128
        pad = (-n) % cols
        x2 = jnp.pad(flat, (0, pad)).reshape(-1, cols)
    R, C = x2.shape

    # ---- tile selection: divisors of (R, C), (8,128)-aligned or full-extent
    tc = C if C <= tc_cap else (_largest_dividing_multiple(C, 128, tc_cap) or tc_cap)
    tr = _largest_dividing_multiple(R, 8, tr_cap)
    if tr is None:
        tr = R if R <= tr_cap else tr_cap  # full-extent (legal) or 8-aligned cap
    # v7x has 2 TensorCores: if the grid would be (1,1) on a mid-size tensor,
    # split rows 2-way so both cores get a block (harmless on v5e/v6e).
    if pl.cdiv(R, tr) == 1 and pl.cdiv(C, tc) == 1 and R >= 16 and R % 16 == 0:
        tr = R // 2
    grid = (pl.cdiv(R, tr), pl.cdiv(C, tc))

    itemsize = jnp.dtype(x2.dtype).itemsize
    out2 = pl.pallas_call(
        _identity_kernel,
        out_shape=jax.ShapeDtypeStruct((R, C), x2.dtype),
        grid=grid,
        in_specs=[pl.BlockSpec((tr, tc), lambda i, j: (i, j))],
        out_specs=pl.BlockSpec((tr, tc), lambda i, j: (i, j)),
        # Identity op: alias input buffer to the output.  The caller should
        # donate x (jax.jit(..., donate_argnums=0)) so XLA skips the
        # defensive copy and the alias actually saves memory + bandwidth.
        input_output_aliases={0: 0},
        cost_estimate=pl.CostEstimate(
            flops=0, transcendentals=0, bytes_accessed=2 * x2.size * itemsize),
        compiler_params=pltpu.CompilerParams(
            dimension_semantics=("parallel", "parallel"),
            vmem_limit_bytes=vmem_limit),
    )(x2)

    if pad:
        out2 = out2.reshape(-1)[:n]
    return out2.reshape(orig_shape)


if __name__ == "__main__":
    key = jax.random.PRNGKey(0)
    shape = (2, 4, 16, 16)  # small NCHW-like debug-layer input
    x = jax.random.normal(key, shape, dtype=jnp.float32)
    # Reference values regenerated from the same key (x itself gets donated below).
    x_ref = jax.random.normal(key, shape, dtype=jnp.float32)

    # Default (recommended) path: pure identity short-circuit, no HBM traffic.
    y0 = jax.block_until_ready(print_layer(x))
    assert y0.shape == shape and y0.dtype == x_ref.dtype
    assert bool(jnp.all(y0 == x_ref))

    # Kernel path: jit with input donation so input_output_aliases={0: 0}
    # avoids a defensive copy.  x (and y0, which aliases it) must not be used
    # after this call.
    fwd = jax.jit(lambda t: print_layer(t, run_kernel=True), donate_argnums=0)
    y = jax.block_until_ready(fwd(x))

    assert y.shape == shape
    assert y.dtype == x_ref.dtype
    assert bool(jnp.all(y == x_ref))
    print("KERNEL_OK")
</pallas_src>

<mosaic_0001>
module attributes {stable_mosaic.version = 11 : i64} {
  func.func @_identity_kernel(%arg0: i32, %arg1: i32, %arg2: memref<1x2048xf32, #tpu.memory_space<vmem>>, %arg3: memref<1x2048xf32, #tpu.memory_space<vmem>>) attributes {dimension_semantics = [#tpu.dimension_semantics<parallel>, #tpu.dimension_semantics<parallel>], iteration_bounds = array<i64: 1, 1>, scalar_prefetch = 0 : i64, scratch_operands = 0 : i64, tpu.core_type = #tpu.core_type<tc>, window_params = [{transform_indices = @transform_0, window_bounds = array<i64: 1, 2048>}, {transform_indices = @transform_1, window_bounds = array<i64: 1, 2048>}]} {
    %c0 = arith.constant 0 : index
    %c0_0 = arith.constant 0 : index
    %0 = vector.load %arg2[%c0, %c0_0] : memref<1x2048xf32, #tpu.memory_space<vmem>>, vector<1x2048xf32>
    %c0_1 = arith.constant 0 : index
    %c0_2 = arith.constant 0 : index
    %1 = vector.load %arg3[%c0_1, %c0_2] : memref<1x2048xf32, #tpu.memory_space<vmem>>, vector<1x2048xf32>
    tpu.vector_store %arg3[%c0_1, %c0_2], %0 {strides = array<i32>} : memref<1x2048xf32, #tpu.memory_space<vmem>>, vector<1x2048xf32>,
    return
  }
  func.func @transform_0(%arg0: i32, %arg1: i32) -> (i32, i32) {
    %c0_i32 = arith.constant 0 : i32
    return %arg0, %arg1 : i32, i32
  }
  func.func @transform_1(%arg0: i32, %arg1: i32) -> (i32, i32) {
    %c0_i32 = arith.constant 0 : i32
    return %arg0, %arg1 : i32, i32
  }
}

</mosaic_0001>

<bundles_post_ra>
// kernel: _lambda_.1
= control target key start
LH: loop header
LB: loop body
LE: loop exit
PB: predicated region body
PF: predicated region fallthrough
CT: control target
= control target key end

     0   :  { %s38_s0 = inlined_call_operand.vmem [shape: f32[1,2048], index: 0, kind: input, shape index: {}, may-alias: {0,1}]   ;;  %s39_s1 = inlined_call_operand.vmem [shape: f32[1,2048], index: 1, kind: output, shape index: {}, may-alias: {0,1}]  }
   0x1   :  { %v8_v0 = vld [vmem:[%s38_s0] sm:$0xff]  ;;  %v9_v1 = vld [vmem:[%s38_s0 + $0x8] sm:$0xff] }
   0x2   :  { %10 = vst [vmem:[%s39_s1] sm:$0xff] %v8_v0  ;;  %11 = vst [vmem:[%s39_s1 + $0x8] sm:$0xff] %v9_v1 }

</bundles_post_ra>
